<compile_context>
chip_gen: v7x
topology: tpu7x:2x2x1
jax: 0.10.0
libtpu: 0.0.40
codegen_flags: <defaults>
</compile_context>

<pallas_src>
import functools
import math

import jax
import jax.numpy as jnp
from jax.experimental import pallas as pl
from jax.experimental.pallas import tpu as pltpu

EPS = 1e-5  # PyTorch GroupNorm default eps


def _round_up(x, m):
    return ((x + m - 1) // m) * m


def _linear_gn_relu_kernel(x_ref, w_ref, gb_ref, a_ref, at_ref, o_ref,
                           *, inv_group_size, act):
    # y = relu(GroupNorm(x @ W)), fused per (tm, n_out) row tile.
    h = jnp.dot(x_ref[...], w_ref[...],
                preferred_element_type=jnp.float32)                  # (tm, n_out) f32

    gamma = gb_ref[0:1, :]                                           # (1, n_out)
    beta = gb_ref[1:2, :]                                            # (1, n_out)
    a = a_ref[...]                                                   # (n_out, G) one-hot
    at = at_ref[...]                                                 # (G, n_out)

    # Group statistics via small matmuls -> stays lane-dense (no (tm, G, Cg)
    # reshape with a tiny minor dim).  Biased variance, like PyTorch GroupNorm.
    sum_g = jnp.dot(h, a, preferred_element_type=jnp.float32)        # (tm, G)
    mean_bc = jnp.dot(sum_g * inv_group_size, at,
                      preferred_element_type=jnp.float32)            # (tm, n_out)
    c = h - mean_bc
    var_g = jnp.dot(c * c, a,
                    preferred_element_type=jnp.float32) * inv_group_size
    rstd_bc = jnp.dot(jax.lax.rsqrt(var_g + EPS), at,
                      preferred_element_type=jnp.float32)            # (tm, n_out)

    y = c * rstd_bc * gamma + beta
    if act:
        y = jnp.maximum(y, 0.0)
    o_ref[...] = y.astype(o_ref.dtype)


@functools.partial(jax.jit,
                   static_argnames=("ng", "act", "compute_dtype", "tm_max"))
def linear_gn_relu(x, weight, gamma, beta, *, ng=32, act=True,
                   compute_dtype=jnp.float32, tm_max=512):
    """Forward of argoverse `Linear` (norm='GN').

    x:      (M, n_in) float32
    weight: (n_out, n_in)  -- PyTorch nn.Linear layout, bias=False
    gamma, beta: (n_out,)  -- GroupNorm affine params
    """
    # TODO(synk): BN / SyncBN norm branches (running-stats semantics) are not
    # implemented; only the default GroupNorm path is translated.
    M, n_in = x.shape
    n_out = weight.shape[0]
    groups = math.gcd(ng, n_out)
    group_size = n_out // groups

    # --- row tiling: big tiles, pad the tail instead of asserting divisibility ---
    tm = min(tm_max, _round_up(M, 64))          # 64 covers f32/bf16 sublane packing
    m_pad = _round_up(M, tm)
    grid = m_pad // tm

    x_p = x.astype(compute_dtype)
    if m_pad != M:
        x_p = jnp.pad(x_p, ((0, m_pad - M), (0, 0)))

    w_t = weight.T.astype(compute_dtype)                              # (n_in, n_out)
    gb = jnp.stack([gamma, beta]).astype(jnp.float32)                 # (2, n_out)

    # One-hot group-membership matrices for the GroupNorm reductions/broadcasts.
    gid = jnp.arange(n_out) // group_size
    a = (gid[:, None] == jnp.arange(groups)[None, :]).astype(jnp.float32)  # (n_out, G)
    at = a.T                                                               # (G, n_out)

    elt = jnp.dtype(compute_dtype).itemsize
    flops = (2 * m_pad * n_in * n_out            # main matmul
             + 4 * 2 * m_pad * n_out * groups    # group-stat matmuls
             + 8 * m_pad * n_out)                # elementwise
    transcendentals = m_pad * groups             # rsqrt
    bytes_accessed = (m_pad * n_in * elt + n_in * n_out * elt
                      + (2 * n_out + 2 * n_out * groups) * 4
                      + m_pad * n_out * 4)

    kernel = functools.partial(_linear_gn_relu_kernel,
                               inv_group_size=1.0 / group_size, act=act)

    out_padded = pl.pallas_call(
        kernel,
        out_shape=jax.ShapeDtypeStruct((m_pad, n_out), jnp.float32),
        grid_spec=pltpu.PrefetchScalarGridSpec(
            num_scalar_prefetch=0,
            grid=(grid,),
            in_specs=[
                pl.BlockSpec((tm, n_in), lambda i: (i, 0)),       # x rows
                pl.BlockSpec((n_in, n_out), lambda i: (0, 0)),    # W^T (invariant)
                pl.BlockSpec((2, n_out), lambda i: (0, 0)),       # packed gamma/beta
                pl.BlockSpec((n_out, groups), lambda i: (0, 0)),  # group one-hot
                pl.BlockSpec((groups, n_out), lambda i: (0, 0)),  # its transpose
            ],
            out_specs=pl.BlockSpec((tm, n_out), lambda i: (i, 0)),
        ),
        compiler_params=pltpu.CompilerParams(
            dimension_semantics=("parallel",)),
        cost_estimate=pl.CostEstimate(
            flops=int(flops),
            transcendentals=int(transcendentals),
            bytes_accessed=int(bytes_accessed)),
    )(x_p, w_t, gb, a, at)

    return out_padded[:M]


def linear_gn_relu_reference(x, weight, gamma, beta, *, ng=32, act=True):
    """Pure-JAX reference mirroring the PyTorch forward (f32 throughout)."""
    M = x.shape[0]
    n_out = weight.shape[0]
    groups = math.gcd(ng, n_out)
    h = x @ weight.T
    hg = h.reshape(M, groups, n_out // groups)
    mu = hg.mean(-1, keepdims=True)
    var = ((hg - mu) ** 2).mean(-1, keepdims=True)
    y = ((hg - mu) / jnp.sqrt(var + EPS)).reshape(M, n_out) * gamma + beta
    return jnp.maximum(y, 0.0) if act else y


if __name__ == "__main__":
    key = jax.random.PRNGKey(0)
    kx, kw, kg, kb = jax.random.split(key, 4)

    # Small shapes consistent with the module: batch of 200 rows, n_in=64,
    # n_out=128, ng=32 -> GroupNorm with gcd(32,128)=32 groups of 4 channels.
    M, n_in, n_out, ng = 200, 64, 128, 32
    x = jax.random.normal(kx, (M, n_in), jnp.float32)
    weight = 0.1 * jax.random.normal(kw, (n_out, n_in), jnp.float32)
    gamma = 1.0 + 0.1 * jax.random.normal(kg, (n_out,), jnp.float32)
    beta = 0.1 * jax.random.normal(kb, (n_out,), jnp.float32)

    # f32 compute path: exact comparison against the PyTorch-semantics reference.
    out = linear_gn_relu(x, weight, gamma, beta, ng=ng)
    out = jax.block_until_ready(out)
    ref = linear_gn_relu_reference(x, weight, gamma, beta, ng=ng)
    assert out.shape == (M, n_out)
    assert jnp.allclose(out, ref, atol=1e-4, rtol=1e-4), "mismatch vs reference"

    # bf16 compute path (perf feedback): same kernel with bf16 MXU inputs,
    # f32 accumulation + f32 GroupNorm math.  Sanity check only.
    out_bf16 = jax.block_until_ready(
        linear_gn_relu(x, weight, gamma, beta, ng=ng,
                       compute_dtype=jnp.bfloat16))
    assert out_bf16.shape == (M, n_out)
    assert bool(jnp.all(jnp.isfinite(out_bf16)))

    print("KERNEL_OK")
</pallas_src>

<mosaic_0001>
module attributes {stable_mosaic.version = 11 : i64} {
  func.func @_linear_gn_relu_kernel(%arg0: i32, %arg1: memref<256x64xf32, #tpu.memory_space<vmem>>, %arg2: memref<64x128xf32, #tpu.memory_space<vmem>>, %arg3: memref<2x128xf32, #tpu.memory_space<vmem>>, %arg4: memref<128x32xf32, #tpu.memory_space<vmem>>, %arg5: memref<32x128xf32, #tpu.memory_space<vmem>>, %arg6: memref<256x128xf32, #tpu.memory_space<vmem>>) attributes {dimension_semantics = [#tpu.dimension_semantics<parallel>], iteration_bounds = array<i64: 1>, scalar_prefetch = 0 : i64, scratch_operands = 0 : i64, tpu.core_type = #tpu.core_type<tc>, window_params = [{transform_indices = @transform_0, window_bounds = array<i64: 256, 64>}, {pipeline_mode = #tpu.pipeline_mode<synchronous>, transform_indices = @transform_1, window_bounds = array<i64: 64, 128>}, {pipeline_mode = #tpu.pipeline_mode<synchronous>, transform_indices = @transform_2, window_bounds = array<i64: 2, 128>}, {pipeline_mode = #tpu.pipeline_mode<synchronous>, transform_indices = @transform_3, window_bounds = array<i64: 128, 32>}, {pipeline_mode = #tpu.pipeline_mode<synchronous>, transform_indices = @transform_4, window_bounds = array<i64: 32, 128>}, {transform_indices = @transform_5, window_bounds = array<i64: 256, 128>}]} {
    %c0 = arith.constant 0 : index
    %c0_0 = arith.constant 0 : index
    %0 = vector.load %arg1[%c0, %c0_0] : memref<256x64xf32, #tpu.memory_space<vmem>>, vector<256x64xf32>
    %c0_1 = arith.constant 0 : index
    %c0_2 = arith.constant 0 : index
    %1 = vector.load %arg2[%c0_1, %c0_2] : memref<64x128xf32, #tpu.memory_space<vmem>>, vector<64x128xf32>
    %cst = arith.constant dense<0.000000e+00> : vector<256x128xf32>
    %2 = tpu.matmul %0, %1, %cst {dimension_numbers = #tpu.dot_dimension_numbers<[1], [0], [0], [1], [0, 0, 1, 1], [], []>} : vector<256x64xf32>, vector<64x128xf32>, vector<256x128xf32> -> vector<256x128xf32>
    %c0_3 = arith.constant 0 : index
    %c0_4 = arith.constant 0 : index
    %3 = vector.load %arg3[%c0_3, %c0_4] : memref<2x128xf32, #tpu.memory_space<vmem>>, vector<1x128xf32>
    %c1 = arith.constant 1 : index
    %c0_5 = arith.constant 0 : index
    %4 = vector.load %arg3[%c1, %c0_5] : memref<2x128xf32, #tpu.memory_space<vmem>>, vector<1x128xf32>
    %c0_6 = arith.constant 0 : index
    %c0_7 = arith.constant 0 : index
    %5 = vector.load %arg4[%c0_6, %c0_7] : memref<128x32xf32, #tpu.memory_space<vmem>>, vector<128x32xf32>
    %c0_8 = arith.constant 0 : index
    %c0_9 = arith.constant 0 : index
    %6 = vector.load %arg5[%c0_8, %c0_9] : memref<32x128xf32, #tpu.memory_space<vmem>>, vector<32x128xf32>
    %cst_10 = arith.constant dense<0.000000e+00> : vector<256x32xf32>
    %7 = tpu.matmul %2, %5, %cst_10 {dimension_numbers = #tpu.dot_dimension_numbers<[1], [0], [0], [1], [0, 0, 1, 1], [], []>} : vector<256x128xf32>, vector<128x32xf32>, vector<256x32xf32> -> vector<256x32xf32>
    %cst_11 = arith.constant 2.500000e-01 : f32
    %8 = vector.broadcast %cst_11 : f32 to vector<256x32xf32>
    %9 = arith.mulf %7, %8 : vector<256x32xf32>
    %cst_12 = arith.constant dense<0.000000e+00> : vector<256x128xf32>
    %10 = tpu.matmul %9, %6, %cst_12 {dimension_numbers = #tpu.dot_dimension_numbers<[1], [0], [0], [1], [0, 0, 1, 1], [], []>} : vector<256x32xf32>, vector<32x128xf32>, vector<256x128xf32> -> vector<256x128xf32>
    %11 = arith.subf %2, %10 : vector<256x128xf32>
    %12 = arith.mulf %11, %11 : vector<256x128xf32>
    %cst_13 = arith.constant dense<0.000000e+00> : vector<256x32xf32>
    %13 = tpu.matmul %12, %5, %cst_13 {dimension_numbers = #tpu.dot_dimension_numbers<[1], [0], [0], [1], [0, 0, 1, 1], [], []>} : vector<256x128xf32>, vector<128x32xf32>, vector<256x32xf32> -> vector<256x32xf32>
    %cst_14 = arith.constant 2.500000e-01 : f32
    %14 = vector.broadcast %cst_14 : f32 to vector<256x32xf32>
    %15 = arith.mulf %13, %14 : vector<256x32xf32>
    %cst_15 = arith.constant 9.99999974E-6 : f32
    %16 = vector.broadcast %cst_15 : f32 to vector<256x32xf32>
    %17 = arith.addf %15, %16 : vector<256x32xf32>
    %18 = math.rsqrt %17 : vector<256x32xf32>
    %cst_16 = arith.constant dense<0.000000e+00> : vector<256x128xf32>
    %19 = tpu.matmul %18, %6, %cst_16 {dimension_numbers = #tpu.dot_dimension_numbers<[1], [0], [0], [1], [0, 0, 1, 1], [], []>} : vector<256x32xf32>, vector<32x128xf32>, vector<256x128xf32> -> vector<256x128xf32>
    %20 = arith.mulf %11, %19 : vector<256x128xf32>
    %21 = vector.broadcast %3 : vector<1x128xf32> to vector<256x128xf32>
    %22 = arith.mulf %20, %21 : vector<256x128xf32>
    %23 = vector.broadcast %4 : vector<1x128xf32> to vector<256x128xf32>
    %24 = arith.addf %22, %23 : vector<256x128xf32>
    %cst_17 = arith.constant 0.000000e+00 : f32
    %25 = vector.broadcast %cst_17 : f32 to vector<256x128xf32>
    %26 = arith.maximumf %24, %25 : vector<256x128xf32>
    %c0_18 = arith.constant 0 : index
    %c0_19 = arith.constant 0 : index
    %27 = vector.load %arg6[%c0_18, %c0_19] : memref<256x128xf32, #tpu.memory_space<vmem>>, vector<256x128xf32>
    tpu.vector_store %arg6[%c0_18, %c0_19], %26 {strides = array<i32>} : memref<256x128xf32, #tpu.memory_space<vmem>>, vector<256x128xf32>,
    return
  }
  func.func @transform_0(%arg0: i32) -> (i32, i32) {
    %c0_i32 = arith.constant 0 : i32
    %c0_i32_0 = arith.constant 0 : i32
    return %arg0, %c0_i32 : i32, i32
  }
  func.func @transform_1(%arg0: i32) -> (i32, i32) {
    %c0_i32 = arith.constant 0 : i32
    %c0_i32_0 = arith.constant 0 : i32
    %c0_i32_1 = arith.constant 0 : i32
    return %c0_i32, %c0_i32_0 : i32, i32
  }
  func.func @transform_2(%arg0: i32) -> (i32, i32) {
    %c0_i32 = arith.constant 0 : i32
    %c0_i32_0 = arith.constant 0 : i32
    %c0_i32_1 = arith.constant 0 : i32
    return %c0_i32, %c0_i32_0 : i32, i32
  }
  func.func @transform_3(%arg0: i32) -> (i32, i32) {
    %c0_i32 = arith.constant 0 : i32
    %c0_i32_0 = arith.constant 0 : i32
    %c0_i32_1 = arith.constant 0 : i32
    return %c0_i32, %c0_i32_0 : i32, i32
  }
  func.func @transform_4(%arg0: i32) -> (i32, i32) {
    %c0_i32 = arith.constant 0 : i32
    %c0_i32_0 = arith.constant 0 : i32
    %c0_i32_1 = arith.constant 0 : i32
    return %c0_i32, %c0_i32_0 : i32, i32
  }
  func.func @transform_5(%arg0: i32) -> (i32, i32) {
    %c0_i32 = arith.constant 0 : i32
    %c0_i32_0 = arith.constant 0 : i32
    return %arg0, %c0_i32 : i32, i32
  }
}

</mosaic_0001>

<bundles_post_ra>
// kernel: linear_gn_relu.1
= control target key start
LH: loop header
LB: loop body
LE: loop exit
PB: predicated region body
PF: predicated region fallthrough
CT: control target
= control target key end

     0   :  { %vm60_vm0 = vcmask 523264   ;;  %vm661_vm1 = vcmask 261120   ;;  %s3495_s1 = inlined_call_operand.vmem [shape: f32[64,128], index: 1, kind: input, shape index: {}]   ;;  %s3496_s0 = inlined_call_operand.vmem [shape: f32[256,64], index: 0, kind: input, shape index: {}]   ;;  %s3497_s3 = inlined_call_operand.vmem [shape: f32[128,32], index: 3, kind: input, shape index: {}]   ;;  %s3498_s4 = inlined_call_operand.vmem [shape: f32[32,128], index: 4, kind: input, shape index: {}]   ;;  %s3499_s2 = inlined_call_operand.vmem [shape: f32[2,128], index: 2, kind: input, shape index: {}]   ;;  %s3500_s5 = inlined_call_operand.vmem [shape: f32[256,128], index: 5, kind: output, shape index: {}]  }
   0x1   :  { %v52_v0 = vld [vmem:[%s3495_s1] sm:$0xff]  ;;  %v53_v1 = vld [vmem:[%s3495_s1 + $0x8] sm:$0xff]  ;;  %v54_v2 = vld [vmem:[%s3495_s1 + $0x10] sm:$0xff] }
   0x2   :  { %v2503_v3 = vpack.c.bf16 %v53_v1, %v52_v0  ;;  %v55_v4 = vld [vmem:[%s3495_s1 + $0x18] sm:$0xff]  ;;  %v56_v6 = vld [vmem:[%s3495_s1 + $0x20] sm:$0xff]  ;;  %v57_v7 = vld [vmem:[%s3495_s1 + $0x28] sm:$0xff] }
   0x3   :  { %v2507_v5 = vpack.c.bf16 %v55_v4, %v54_v2  ;;  %v20_v8 = vld [vmem:[%s3496_s0] sm:$0xff]  ;;  %v2511_v9 = vpack.c.bf16 %v57_v7, %v56_v6  ;;  %v58_v10 = vld [vmem:[%s3495_s1 + $0x30] sm:$0xff]  ;;  %v59_v11 = vld [vmem:[%s3495_s1 + $0x38] sm:$0xff] }
   0x4   :  { %2504 = vmatprep.subr.bf16.mxu0 %v2503_v3  ;;  %2183 = vmatprep.mubr.msk.f32.mxu0 %vm60_vm0, %v20_v8  ;;  %v36_v12 = vld [vmem:[%s3496_s0 + $0x80] sm:$0xff]  ;;  %v2515_v13 = vpack.c.bf16 %v59_v11, %v58_v10  ;;  %v385_v15 = vld [vmem:[%s3497_s3 + $0x8] sm:$0xff]  ;;  %v386_v17 = vld [vmem:[%s3497_s3 + $0x10] sm:$0xff] }
   0x5   :  { %2506 = vmatpush3.bf16.msra.mxu0 %v2503_v3  ;;  %2599 = vmatprep.subr.bf16.mxu1 %v2503_v3  ;;  %v384_v14 = vld [vmem:[%s3497_s3] sm:$0xff]  ;;  %v387_v18 = vld [vmem:[%s3497_s3 + $0x18] sm:$0xff]  ;;  %v21_v19 = vld [vmem:[%s3496_s0 + $0x8] sm:$0xff] }
   0x6   :  { %2508 = vmatprep.subr.bf16.mxu0 %v2507_v5  ;;  %2603 = vmatpush3.bf16.msra.mxu1 %v2503_v3  ;;  %v2739_v16 = vpack.c.bf16 %v385_v15, %v384_v14  ;;  %v22_v20 = vld [vmem:[%s3496_s0 + $0x10] sm:$0xff]  ;;  %v37_v21 = vld [vmem:[%s3496_s0 + $0x88] sm:$0xff]  ;;  %v2760_v23 = vpack.c.bf16 %v387_v18, %v386_v17  ;;  %v388_v24 = vld [vmem:[%s3497_s3 + $0x20] sm:$0xff] }
   0x7   :  { %2600 = vmatprep.subr.bf16.mxu1 %v2507_v5  ;;  %2207 = vmatprep.mubr.msk.f32.mxu1 %vm60_vm0, %v36_v12  ;;  %v38_v22 = vld [vmem:[%s3496_s0 + $0x90] sm:$0xff]  ;;  %v389_v25 = vld [vmem:[%s3497_s3 + $0x28] sm:$0xff]  ;;  %v23_v26 = vld [vmem:[%s3496_s0 + $0x18] sm:$0xff] }
   0x8   :  { %v24_v27 = vld [vmem:[%s3496_s0 + $0x20] sm:$0xff]  ;;  %v39_v28 = vld [vmem:[%s3496_s0 + $0x98] sm:$0xff]  ;;  %v2786_v30 = vpack.c.bf16 %v389_v25, %v388_v24  ;;  %v390_v31 = vld [vmem:[%s3497_s3 + $0x30] sm:$0xff] }
   0x9   :  { %2510 = vmatpush3.bf16.msra.mxu0 %v2507_v5  ;;  %v40_v29 = vld [vmem:[%s3496_s0 + $0xa0] sm:$0xff]  ;;  %v391_v32 = vld [vmem:[%s3497_s3 + $0x38] sm:$0xff]  ;;  %v25_v33 = vld [vmem:[%s3496_s0 + $0x28] sm:$0xff] }
   0xa   :  { %2512 = vmatprep.subr.bf16.mxu0 %v2511_v9  ;;  %2604 = vmatpush3.bf16.msra.mxu1 %v2507_v5  ;;  %v26_v34 = vld [vmem:[%s3496_s0 + $0x30] sm:$0xff]  ;;  %v41_v35 = vld [vmem:[%s3496_s0 + $0xa8] sm:$0xff]  ;;  %v2812_v37 = vpack.c.bf16 %v391_v32, %v390_v31  ;;  %v392_v38 = vld [vmem:[%s3497_s3 + $0x40] sm:$0xff] }
   0xb   :  { %2601 = vmatprep.subr.bf16.mxu1 %v2511_v9  ;;  %v42_v36 = vld [vmem:[%s3496_s0 + $0xb0] sm:$0xff]  ;;  %v393_v39 = vld [vmem:[%s3497_s3 + $0x48] sm:$0xff]  ;;  %v27_v40 = vld [vmem:[%s3496_s0 + $0x38] sm:$0xff] }
   0xc   :  { %v28_v41 = vld [vmem:[%s3496_s0 + $0x40] sm:$0xff]  ;;  %v43_v42 = vld [vmem:[%s3496_s0 + $0xb8] sm:$0xff]  ;;  %v2838_v44 = vpack.c.bf16 %v393_v39, %v392_v38  ;;  %v394_v45 = vld [vmem:[%s3497_s3 + $0x50] sm:$0xff] }
   0xd   :  { %2514 = vmatpush3.bf16.msra.mxu0 %v2511_v9  ;;  %v44_v43 = vld [vmem:[%s3496_s0 + $0xc0] sm:$0xff]  ;;  %v395_v46 = vld [vmem:[%s3497_s3 + $0x58] sm:$0xff]  ;;  %v29_v47 = vld [vmem:[%s3496_s0 + $0x48] sm:$0xff] }
   0xe   :  { %2516 = vmatprep.subr.bf16.mxu0 %v2515_v13  ;;  %2605 = vmatpush3.bf16.msra.mxu1 %v2511_v9  ;;  %v30_v48 = vld [vmem:[%s3496_s0 + $0x50] sm:$0xff]  ;;  %v45_v49 = vld [vmem:[%s3496_s0 + $0xc8] sm:$0xff]  ;;  %v2864_v51 = vpack.c.bf16 %v395_v46, %v394_v45  ;;  %v396_v52 = vld [vmem:[%s3497_s3 + $0x60] sm:$0xff] }
   0xf   :  { %2602 = vmatprep.subr.bf16.mxu1 %v2515_v13  ;;  %v46_v50 = vld [vmem:[%s3496_s0 + $0xd0] sm:$0xff]  ;;  %v397_v53 = vld [vmem:[%s3497_s3 + $0x68] sm:$0xff]  ;;  %v31_v54 = vld [vmem:[%s3496_s0 + $0x58] sm:$0xff] }
  0x10   :  { %v32_v55 = vld [vmem:[%s3496_s0 + $0x60] sm:$0xff]  ;;  %v47_v56 = vld [vmem:[%s3496_s0 + $0xd8] sm:$0xff]  ;;  %v2890_v58 = vpack.c.bf16 %v397_v53, %v396_v52  ;;  %v398_v59 = vld [vmem:[%s3497_s3 + $0x70] sm:$0xff] }
  0x11   :  { %2518 = vmatpush3.bf16.msra.mxu0 %v2515_v13  ;;  %v48_v57 = vld [vmem:[%s3496_s0 + $0xe0] sm:$0xff]  ;;  %v399_v60 = vld [vmem:[%s3497_s3 + $0x78] sm:$0xff]  ;;  %v33_v61 = vld [vmem:[%s3496_s0 + $0x68] sm:$0xff] }
  0x12   :  { %2606 = vmatpush3.bf16.msra.mxu1 %v2515_v13  ;;  %v34_v62 = vld [vmem:[%s3496_s0 + $0x70] sm:$0xff]  ;;  %v49_v63 = vld [vmem:[%s3496_s0 + $0xe8] sm:$0xff]  ;;  %v2916_v1 = vpack.c.bf16 %v399_v60, %v398_v59  ;;  %v35_v2 = vld [vmem:[%s3496_s0 + $0x78] sm:$0xff] }
  0x13   :  { %2520 = vmatprep.subr.bf16.mxu1 %v2739_v16  ;;  %v50_v0 = vld [vmem:[%s3496_s0 + $0xf0] sm:$0xff]  ;;  %v51_v3 = vld [vmem:[%s3496_s0 + $0xf8] sm:$0xff]  ;;  %v400_v4 = vld [vmem:[%s3498_s4] sm:$0xff] }
  0x14   :  { %2184 = vmatmul.mubr.msk.f32.vlgmr.msra.gmra.mrb[0].mxu0 %vm60_vm0, %v21_v19  ;;  %v401_v5 = vld [vmem:[%s3498_s4 + $0x8] sm:$0xff]  ;;  %v402_v6 = vld [vmem:[%s3498_s4 + $0x10] sm:$0xff]  ;;  %v403_v8 = vld [vmem:[%s3498_s4 + $0x18] sm:$0xff] }
  0x15   :  { %2186 = vmatprep.mubr.msk.f32.mxu0 %vm60_vm0, %v22_v20  ;;  %2208 = vmatmul.mubr.msk.f32.vlgmr.msra.gmra.mrb[0].mxu1 %vm60_vm0, %v37_v21  ;;  %v2943_v7 = vpack.c.bf16 %v401_v5, %v400_v4  ;;  %v2948_v9 = vpack.c.bf16 %v403_v8, %v402_v6 }
  0x16   :  { %2210 = vmatprep.mubr.msk.f32.mxu1 %vm60_vm0, %v38_v22  ;;  %2522 = vmatpush3.bf16.msra.mxu1 %v2739_v16 }
  0x17   :  { %2524 = vmatprep.subr.bf16.mxu1 %v2760_v23  ;;  %2552 = vmatprep.subr.bf16.mxu0 %v2943_v7 }
  0x18   :  { %2187 = vmatmul.mubr.msk.f32.gmra.mrb[2].mxu0 %vm60_vm0, %v23_v26 }
  0x19   :  { %2189 = vmatprep.mubr.msk.f32.mxu0 %vm60_vm0, %v24_v27  ;;  %2211 = vmatmul.mubr.msk.f32.gmra.mrb[2].mxu1 %vm60_vm0, %v39_v28 }
  0x1a   :  { %2213 = vmatprep.mubr.msk.f32.mxu1 %vm60_vm0, %v40_v29  ;;  %2526 = vmatpush3.bf16.msra.mxu1 %v2760_v23 }
  0x1b   :  { %2528 = vmatprep.subr.bf16.mxu1 %v2786_v30  ;;  %2554 = vmatpush3.bf16.msra.mxu0 %v2943_v7 }
  0x1c   :  { %2190 = vmatmul.mubr.msk.f32.gmra.mrb[4].mxu0 %vm60_vm0, %v25_v33  ;;  %2556 = vmatprep.subr.bf16.mxu0 %v2948_v9 }
  0x1d   :  { %2192 = vmatprep.mubr.msk.f32.mxu0 %vm60_vm0, %v26_v34  ;;  %2214 = vmatmul.mubr.msk.f32.gmra.mrb[4].mxu1 %vm60_vm0, %v41_v35 }
  0x1e   :  { %2216 = vmatprep.mubr.msk.f32.mxu1 %vm60_vm0, %v42_v36  ;;  %2530 = vmatpush3.bf16.msra.mxu1 %v2786_v30 }
  0x1f   :  { %2532 = vmatprep.subr.bf16.mxu1 %v2812_v37  ;;  %2558 = vmatpush3.bf16.msra.mxu0 %v2948_v9 }
  0x20   :  { %2193 = vmatmul.mubr.msk.f32.gmra.mrb[6].mxu0 %vm60_vm0, %v27_v40  ;;  %2592 = vmatprep.subr.bf16.mxu0 %v2943_v7 }
  0x21   :  { %2195 = vmatprep.mubr.msk.f32.mxu0 %vm60_vm0, %v28_v41  ;;  %2217 = vmatmul.mubr.msk.f32.gmra.mrb[6].mxu1 %vm60_vm0, %v43_v42 }
  0x22   :  { %2219 = vmatprep.mubr.msk.f32.mxu1 %vm60_vm0, %v44_v43  ;;  %2534 = vmatpush3.bf16.msra.mxu1 %v2812_v37 }
  0x23   :  { %2536 = vmatprep.subr.bf16.mxu1 %v2838_v44 }
  0x24   :  { %2196 = vmatmul.mubr.msk.f32.gmra.mrb[8].mxu0 %vm60_vm0, %v29_v47 }
  0x25   :  { %2198 = vmatprep.mubr.msk.f32.mxu0 %vm60_vm0, %v30_v48  ;;  %2220 = vmatmul.mubr.msk.f32.gmra.mrb[8].mxu1 %vm60_vm0, %v45_v49 }
  0x26   :  { %2222 = vmatprep.mubr.msk.f32.mxu1 %vm60_vm0, %v46_v50  ;;  %2538 = vmatpush3.bf16.msra.mxu1 %v2838_v44 }
  0x27   :  { %2540 = vmatprep.subr.bf16.mxu1 %v2864_v51 }
  0x28   :  { %2199 = vmatmul.mubr.msk.f32.gmra.mrb[10].mxu0 %vm60_vm0, %v31_v54 }
  0x29   :  { %2201 = vmatprep.mubr.msk.f32.mxu0 %vm60_vm0, %v32_v55  ;;  %2223 = vmatmul.mubr.msk.f32.gmra.mrb[10].mxu1 %vm60_vm0, %v47_v56 }
  0x2a   :  { %2225 = vmatprep.mubr.msk.f32.mxu1 %vm60_vm0, %v48_v57  ;;  %2542 = vmatpush3.bf16.msra.mxu1 %v2864_v51 }
  0x2b   :  { %2544 = vmatprep.subr.bf16.mxu1 %v2890_v58 }
  0x2c   :  { %2202 = vmatmul.mubr.msk.f32.gmra.mrb[12].mxu0 %vm60_vm0, %v33_v61 }
  0x2d   :  { %2204 = vmatprep.mubr.msk.f32.mxu0 %vm60_vm0, %v34_v62  ;;  %2226 = vmatmul.mubr.msk.f32.gmra.mrb[12].mxu1 %vm60_vm0, %v49_v63 }
  0x2e   :  { %2228 = vmatprep.mubr.msk.f32.mxu1 %vm60_vm0, %v50_v0  ;;  %2546 = vmatpush3.bf16.msra.mxu1 %v2890_v58 }
  0x2f   :  { %2548 = vmatprep.subr.bf16.mxu1 %v2916_v1 }
  0x30   :  { %2205 = vmatmul.mubr.msk.f32.gmra.mrb[14].mxu0 %vm60_vm0, %v35_v2 }
  0x31   :  { %2229 = vmatmul.mubr.msk.f32.gmra.mrb[14].mxu1 %vm60_vm0, %v51_v3 }
  0x32   :  { %2550 = vmatpush3.bf16.msra.mxu1 %v2916_v1 }
  0x33   :  { %2560 = vmatprep.subr.bf16.mxu1 %v2739_v16 }
  0xe7   :  { %v2955_v10 = vpop.f32.mrb[0].mxu0 }
  0xe8   :  { %v2957_v11 = vpop.f32.mrb[1].mxu0  ;;  %v2959_v12 = vpop.f32.mrb[0].mxu1 }
  0xe9   :  { %2263 = vmatprep.mubr.f32.mxu1 %v2957_v11  ;;  %v2962_v13 = vpop.f32.mrb[1].mxu1 }
  0xea   :  { %2264 = vmatmul.mubr.f32.vlgmr.msra.gmra.mrb[16].mxu1 %v2955_v10 }
  0xeb   :  { %v2965_v14 = vpop.f32.mrb[2].mxu0  ;;  %2562 = vmatpush3.bf16.msra.mxu1 %v2739_v16 }
  0xec   :  { %v2968_v15 = vpop.f32.mrb[3].mxu0  ;;  %v2970_v17 = vpop.f32.mrb[2].mxu1  ;;  %2564 = vmatprep.subr.bf16.mxu1 %v2760_v23 }
  0xed   :  { %2266 = vmatprep.mubr.f32.mxu1 %v2968_v15  ;;  %v2974_v18 = vpop.f32.mrb[3].mxu1 }
  0xee   :  { %2267 = vmatmul.mubr.f32.gmra.mrb[18].mxu1 %v2965_v14 }
  0xef   :  { %v2977_v19 = vpop.f32.mrb[4].mxu0  ;;  %2566 = vmatpush3.bf16.msra.mxu1 %v2760_v23 }
  0xf0   :  { %v2980_v20 = vpop.f32.mrb[5].mxu0  ;;  %v2982_v21 = vpop.f32.mrb[4].mxu1  ;;  %2568 = vmatprep.subr.bf16.mxu1 %v2786_v30 }
  0xf1   :  { %2269 = vmatprep.mubr.f32.mxu1 %v2980_v20  ;;  %v2986_v16 = vpop.f32.mrb[5].mxu1 }
  0xf2   :  { %2270 = vmatmul.mubr.f32.gmra.mrb[20].mxu1 %v2977_v19 }
  0xf3   :  { %v2989_v22 = vpop.f32.mrb[6].mxu0  ;;  %2570 = vmatpush3.bf16.msra.mxu1 %v2786_v30 }
  0xf4   :  { %v2992_v24 = vpop.f32.mrb[7].mxu0  ;;  %v2994_v25 = vpop.f32.mrb[6].mxu1  ;;  %2572 = vmatprep.subr.bf16.mxu1 %v2812_v37 }
  0xf5   :  { %2272 = vmatprep.mubr.f32.mxu1 %v2992_v24  ;;  %v2998_v23 = vpop.f32.mrb[7].mxu1 }
  0xf6   :  { %2273 = vmatmul.mubr.f32.gmra.mrb[22].mxu1 %v2989_v22 }
  0xf7   :  { %v3001_v26 = vpop.f32.mrb[8].mxu0  ;;  %2574 = vmatpush3.bf16.msra.mxu1 %v2812_v37 }
  0xf8   :  { %v3004_v27 = vpop.f32.mrb[9].mxu0  ;;  %v3006_v28 = vpop.f32.mrb[8].mxu1  ;;  %2576 = vmatprep.subr.bf16.mxu1 %v2838_v44 }
  0xf9   :  { %2275 = vmatprep.mubr.f32.mxu1 %v3004_v27  ;;  %v3010_v29 = vpop.f32.mrb[9].mxu1 }
  0xfa   :  { %2276 = vmatmul.mubr.f32.gmra.mrb[24].mxu1 %v3001_v26 }
  0xfb   :  { %v3013_v30 = vpop.f32.mrb[10].mxu0  ;;  %2578 = vmatpush3.bf16.msra.mxu1 %v2838_v44 }
  0xfc   :  { %v3016_v31 = vpop.f32.mrb[11].mxu0  ;;  %v3018_v32 = vpop.f32.mrb[10].mxu1  ;;  %2580 = vmatprep.subr.bf16.mxu1 %v2864_v51 }
  0xfd   :  { %2278 = vmatprep.mubr.f32.mxu1 %v3016_v31  ;;  %v3022_v33 = vpop.f32.mrb[11].mxu1 }
  0xfe   :  { %2279 = vmatmul.mubr.f32.gmra.mrb[26].mxu1 %v3013_v30 }
  0xff   :  { %v3025_v34 = vpop.f32.mrb[12].mxu0  ;;  %2582 = vmatpush3.bf16.msra.mxu1 %v2864_v51 }
 0x100   :  { %v3028_v35 = vpop.f32.mrb[13].mxu0  ;;  %v3030_v36 = vpop.f32.mrb[12].mxu1  ;;  %2584 = vmatprep.subr.bf16.mxu1 %v2890_v58 }
 0x101   :  { %2281 = vmatprep.mubr.f32.mxu1 %v3028_v35  ;;  %v3034_v37 = vpop.f32.mrb[13].mxu1 }
 0x102   :  { %2282 = vmatmul.mubr.f32.gmra.mrb[28].mxu1 %v3025_v34 }
 0x103   :  { %v3037_v38 = vpop.f32.mrb[14].mxu0  ;;  %2586 = vmatpush3.bf16.msra.mxu1 %v2890_v58 }
 0x104   :  { %v3040_v39 = vpop.f32.mrb[15].mxu0  ;;  %v3042_v40 = vpop.f32.mrb[14].mxu1  ;;  %2588 = vmatprep.subr.bf16.mxu1 %v2916_v1 }
 0x105   :  { %2284 = vmatprep.mubr.f32.mxu1 %v3040_v39  ;;  %v3046_v41 = vpop.f32.mrb[15].mxu1 }
 0x106   :  { %2285 = vmatmul.mubr.f32.gmra.mrb[30].mxu1 %v3037_v38 }
 0x107   :  { %2287 = vmatprep.mubr.f32.mxu1 %v2962_v13  ;;  %2590 = vmatpush3.bf16.msra.mxu1 %v2916_v1 }
 0x10a   :  { %2288 = vmatmul.mubr.f32.gmra.mrb[32].mxu1 %v2959_v12 }
 0x10b   :  { %2290 = vmatprep.mubr.f32.mxu1 %v2974_v18 }
 0x10e   :  { %2291 = vmatmul.mubr.f32.gmra.mrb[34].mxu1 %v2970_v17 }
 0x10f   :  { %2293 = vmatprep.mubr.f32.mxu1 %v2986_v16 }
 0x112   :  { %2294 = vmatmul.mubr.f32.gmra.mrb[36].mxu1 %v2982_v21 }
 0x113   :  { %2296 = vmatprep.mubr.f32.mxu1 %v2998_v23 }
 0x116   :  { %2297 = vmatmul.mubr.f32.gmra.mrb[38].mxu1 %v2994_v25 }
 0x117   :  { %2299 = vmatprep.mubr.f32.mxu1 %v3010_v29 }
 0x11a   :  { %2300 = vmatmul.mubr.f32.gmra.mrb[40].mxu1 %v3006_v28 }
 0x11b   :  { %2302 = vmatprep.mubr.f32.mxu1 %v3022_v33 }
 0x11e   :  { %2303 = vmatmul.mubr.f32.gmra.mrb[42].mxu1 %v3018_v32 }
 0x11f   :  { %2305 = vmatprep.mubr.f32.mxu1 %v3034_v37 }
 0x122   :  { %2306 = vmatmul.mubr.f32.gmra.mrb[44].mxu1 %v3030_v36 }
 0x123   :  { %2308 = vmatprep.mubr.f32.mxu1 %v3046_v41 }
 0x126   :  { %2309 = vmatmul.mubr.f32.gmra.mrb[46].mxu1 %v3042_v40 }
 0x1bd   :  { %v2265_v42 = vpop.f32.mrb[16].mxu1 }
 0x1be   :  { %v470_v43 = vpop.f32.mrb[17].mxu1  ;;  %v630_v45 = vmul.f32 0.25, %v2265_v42 }
 0x1bf   :  { %v629_v44 = vmul.f32 0.25, %v470_v43 }
 0x1c1   :  { %v2268_v46 = vpop.f32.mrb[18].mxu1  ;;  %2319 = vmatprep.mubr.msk.f32.mxu0 %vm661_vm1, %v629_v44 }
 0x1c2   :  { %v480_v47 = vpop.f32.mrb[19].mxu1  ;;  %2320 = vmatmul.mubr.msk.f32.vlgmr.msra.gmra.mrb[16].mxu0 %vm661_vm1, %v630_v45  ;;  %v632_v49 = vmul.f32 0.25, %v2268_v46 }
 0x1c3   :  { %v631_v48 = vmul.f32 0.25, %v480_v47  ;;  %2594 = vmatpush3.bf16.msra.mxu0 %v2943_v7 }
 0x1c4   :  { %2596 = vmatprep.subr.bf16.mxu0 %v2948_v9 }
 0x1c5   :  { %v2271_v50 = vpop.f32.mrb[20].mxu1  ;;  %2322 = vmatprep.mubr.msk.f32.mxu0 %vm661_vm1, %v631_v48 }
 0x1c6   :  { %v490_v51 = vpop.f32.mrb[21].mxu1  ;;  %2323 = vmatmul.mubr.msk.f32.gmra.mrb[18].mxu0 %vm661_vm1, %v632_v49  ;;  %v634_v53 = vmul.f32 0.25, %v2271_v50 }
 0x1c7   :  { %v633_v52 = vmul.f32 0.25, %v490_v51  ;;  %2598 = vmatpush3.bf16.msra.mxu0 %v2948_v9 }
 0x1c9   :  { %v2274_v54 = vpop.f32.mrb[22].mxu1  ;;  %2325 = vmatprep.mubr.msk.f32.mxu0 %vm661_vm1, %v633_v52 }
 0x1ca   :  { %v500_v55 = vpop.f32.mrb[23].mxu1  ;;  %2326 = vmatmul.mubr.msk.f32.gmra.mrb[20].mxu0 %vm661_vm1, %v634_v53  ;;  %v636_v57 = vmul.f32 0.25, %v2274_v54 }
 0x1cb   :  { %v635_v56 = vmul.f32 0.25, %v500_v55 }
 0x1cd   :  { %v2277_v58 = vpop.f32.mrb[24].mxu1  ;;  %2328 = vmatprep.mubr.msk.f32.mxu0 %vm661_vm1, %v635_v56 }
 0x1ce   :  { %v510_v59 = vpop.f32.mrb[25].mxu1  ;;  %2329 = vmatmul.mubr.msk.f32.gmra.mrb[22].mxu0 %vm661_vm1, %v636_v57  ;;  %v638_v61 = vmul.f32 0.25, %v2277_v58 }
 0x1cf   :  { %v637_v60 = vmul.f32 0.25, %v510_v59 }
 0x1d1   :  { %v2280_v62 = vpop.f32.mrb[26].mxu1  ;;  %2331 = vmatprep.mubr.msk.f32.mxu0 %vm661_vm1, %v637_v60 }
 0x1d2   :  { %v520_v63 = vpop.f32.mrb[27].mxu1  ;;  %2332 = vmatmul.mubr.msk.f32.gmra.mrb[24].mxu0 %vm661_vm1, %v638_v61  ;;  %v640_v1 = vmul.f32 0.25, %v2280_v62 }
 0x1d3   :  { %v639_v0 = vmul.f32 0.25, %v520_v63 }
 0x1d5   :  { %v2283_v2 = vpop.f32.mrb[28].mxu1  ;;  %2334 = vmatprep.mubr.msk.f32.mxu0 %vm661_vm1, %v639_v0 }
 0x1d6   :  { %v530_v3 = vpop.f32.mrb[29].mxu1  ;;  %2335 = vmatmul.mubr.msk.f32.gmra.mrb[26].mxu0 %vm661_vm1, %v640_v1  ;;  %v642_v5 = vmul.f32 0.25, %v2283_v2 }
 0x1d7   :  { %v641_v4 = vmul.f32 0.25, %v530_v3 }
 0x1d9   :  { %v2286_v6 = vpop.f32.mrb[30].mxu1  ;;  %2337 = vmatprep.mubr.msk.f32.mxu0 %vm661_vm1, %v641_v4 }
 0x1da   :  { %v540_v7 = vpop.f32.mrb[31].mxu1  ;;  %2338 = vmatmul.mubr.msk.f32.gmra.mrb[28].mxu0 %vm661_vm1, %v642_v5  ;;  %v644_v9 = vmul.f32 0.25, %v2286_v6 }
 0x1db   :  { %v643_v8 = vmul.f32 0.25, %v540_v7 }
 0x1dd   :  { %v2289_v42 = vpop.f32.mrb[32].mxu1  ;;  %2340 = vmatprep.mubr.msk.f32.mxu0 %vm661_vm1, %v643_v8 }
 0x1de   :  { %v550_v43 = vpop.f32.mrb[33].mxu1  ;;  %2341 = vmatmul.mubr.msk.f32.gmra.mrb[30].mxu0 %vm661_vm1, %v644_v9  ;;  %v646_v45 = vmul.f32 0.25, %v2289_v42 }
 0x1df   :  { %v645_v44 = vmul.f32 0.25, %v550_v43 }
 0x1e1   :  { %v2292_v46 = vpop.f32.mrb[34].mxu1  ;;  %2343 = vmatprep.mubr.msk.f32.mxu0 %vm661_vm1, %v645_v44 }
 0x1e2   :  { %v560_v47 = vpop.f32.mrb[35].mxu1  ;;  %2344 = vmatmul.mubr.msk.f32.gmra.mrb[32].mxu0 %vm661_vm1, %v646_v45  ;;  %v648_v49 = vmul.f32 0.25, %v2292_v46 }
 0x1e3   :  { %v647_v48 = vmul.f32 0.25, %v560_v47 }
 0x1e5   :  { %v2295_v50 = vpop.f32.mrb[36].mxu1  ;;  %2346 = vmatprep.mubr.msk.f32.mxu0 %vm661_vm1, %v647_v48 }
 0x1e6   :  { %v570_v51 = vpop.f32.mrb[37].mxu1  ;;  %2347 = vmatmul.mubr.msk.f32.gmra.mrb[34].mxu0 %vm661_vm1, %v648_v49  ;;  %v650_v53 = vmul.f32 0.25, %v2295_v50 }
 0x1e7   :  { %v649_v52 = vmul.f32 0.25, %v570_v51 }
 0x1e9   :  { %v2298_v54 = vpop.f32.mrb[38].mxu1  ;;  %2349 = vmatprep.mubr.msk.f32.mxu0 %vm661_vm1, %v649_v52 }
 0x1ea   :  { %v580_v55 = vpop.f32.mrb[39].mxu1  ;;  %2350 = vmatmul.mubr.msk.f32.gmra.mrb[36].mxu0 %vm661_vm1, %v650_v53  ;;  %v652_v57 = vmul.f32 0.25, %v2298_v54 }
 0x1eb   :  { %v651_v56 = vmul.f32 0.25, %v580_v55 }
 0x1ed   :  { %v2301_v58 = vpop.f32.mrb[40].mxu1  ;;  %2352 = vmatprep.mubr.msk.f32.mxu0 %vm661_vm1, %v651_v56 }
 0x1ee   :  { %v590_v59 = vpop.f32.mrb[41].mxu1  ;;  %2353 = vmatmul.mubr.msk.f32.gmra.mrb[38].mxu0 %vm661_vm1, %v652_v57  ;;  %v654_v61 = vmul.f32 0.25, %v2301_v58 }
 0x1ef   :  { %v653_v60 = vmul.f32 0.25, %v590_v59 }
 0x1f1   :  { %v2304_v62 = vpop.f32.mrb[42].mxu1  ;;  %2355 = vmatprep.mubr.msk.f32.mxu0 %vm661_vm1, %v653_v60 }
 0x1f2   :  { %v600_v63 = vpop.f32.mrb[43].mxu1  ;;  %2356 = vmatmul.mubr.msk.f32.gmra.mrb[40].mxu0 %vm661_vm1, %v654_v61  ;;  %v656_v1 = vmul.f32 0.25, %v2304_v62 }
 0x1f3   :  { %v655_v0 = vmul.f32 0.25, %v600_v63 }
 0x1f5   :  { %v2307_v2 = vpop.f32.mrb[44].mxu1  ;;  %2358 = vmatprep.mubr.msk.f32.mxu0 %vm661_vm1, %v655_v0 }
 0x1f6   :  { %v610_v3 = vpop.f32.mrb[45].mxu1  ;;  %2359 = vmatmul.mubr.msk.f32.gmra.mrb[42].mxu0 %vm661_vm1, %v656_v1  ;;  %v658_v5 = vmul.f32 0.25, %v2307_v2 }
 0x1f7   :  { %v657_v4 = vmul.f32 0.25, %v610_v3 }
 0x1f9   :  { %v2310_v6 = vpop.f32.mrb[46].mxu1  ;;  %2361 = vmatprep.mubr.msk.f32.mxu0 %vm661_vm1, %v657_v4 }
 0x1fa   :  { %v620_v7 = vpop.f32.mrb[47].mxu1  ;;  %2362 = vmatmul.mubr.msk.f32.gmra.mrb[44].mxu0 %vm661_vm1, %v658_v5  ;;  %v660_v9 = vmul.f32 0.25, %v2310_v6 }
 0x1fb   :  { %v659_v8 = vmul.f32 0.25, %v620_v7 }
 0x1fd   :  { %2364 = vmatprep.mubr.msk.f32.mxu0 %vm661_vm1, %v659_v8 }
 0x1fe   :  { %2365 = vmatmul.mubr.msk.f32.gmra.mrb[46].mxu0 %vm661_vm1, %v660_v9 }
 0x295   :  { %v2321_v42 = vpop.f32.mrb[16].mxu0 }
 0x296   :  { %v3102_v43 = vsub.f32 %v2955_v10, %v2321_v42  ;;  %v824_v44 = vpop.f32.mrb[17].mxu0 }
 0x297   :  { %v3105_v45 = vsub.f32 %v2957_v11, %v824_v44 }
 0x298   :  { %v1016_v48 = vmul.f32 %v3102_v43, %v3102_v43 }
 0x299   :  { %v1015_v46 = vmul.f32 %v3105_v45, %v3105_v45  ;;  %v2324_v47 = vpop.f32.mrb[18].mxu0 }
 0x29a   :  { %v3112_v49 = vsub.f32 %v2965_v14, %v2324_v47  ;;  %v834_v50 = vpop.f32.mrb[19].mxu0 }
 0x29b   :  { %v3115_v51 = vsub.f32 %v2968_v15, %v834_v50  ;;  %2399 = vmatprep.mubr.f32.mxu1 %v1015_v46 }
 0x29c   :  { %2400 = vmatmul.mubr.f32.vlgmr.msra.gmra.mrb[48].mxu1 %v1016_v48  ;;  %v1018_v52 = vmul.f32 %v3112_v49, %v3112_v49 }
 0x29d   :  { %v1017_v10 = vmul.f32 %v3115_v51, %v3115_v51  ;;  %v2327_v11 = vpop.f32.mrb[20].mxu0 }
 0x29e   :  { %v3122_v53 = vsub.f32 %v2977_v19, %v2327_v11  ;;  %v844_v54 = vpop.f32.mrb[21].mxu0 }
 0x29f   :  { %v3125_v14 = vsub.f32 %v2980_v20, %v844_v54  ;;  %2402 = vmatprep.mubr.f32.mxu1 %v1017_v10 }
 0x2a0   :  { %2403 = vmatmul.mubr.f32.gmra.mrb[50].mxu1 %v1018_v52  ;;  %v1020_v56 = vmul.f32 %v3122_v53, %v3122_v53 }
 0x2a1   :  { %v1019_v15 = vmul.f32 %v3125_v14, %v3125_v14  ;;  %v2330_v55 = vpop.f32.mrb[22].mxu0 }
 0x2a2   :  { %v3132_v57 = vsub.f32 %v2989_v22, %v2330_v55  ;;  %v854_v58 = vpop.f32.mrb[23].mxu0 }
 0x2a3   :  { %v3135_v19 = vsub.f32 %v2992_v24, %v854_v58  ;;  %2405 = vmatprep.mubr.f32.mxu1 %v1019_v15 }
 0x2a4   :  { %2406 = vmatmul.mubr.f32.gmra.mrb[52].mxu1 %v1020_v56  ;;  %v1022_v60 = vmul.f32 %v3132_v57, %v3132_v57 }
 0x2a5   :  { %v1021_v20 = vmul.f32 %v3135_v19, %v3135_v19  ;;  %v2333_v59 = vpop.f32.mrb[24].mxu0 }
 0x2a6   :  { %v3142_v61 = vsub.f32 %v3001_v26, %v2333_v59  ;;  %v864_v62 = vpop.f32.mrb[25].mxu0 }
 0x2a7   :  { %v3145_v22 = vsub.f32 %v3004_v27, %v864_v62  ;;  %2408 = vmatprep.mubr.f32.mxu1 %v1021_v20 }
 0x2a8   :  { %2409 = vmatmul.mubr.f32.gmra.mrb[54].mxu1 %v1022_v60  ;;  %v1024_v0 = vmul.f32 %v3142_v61, %v3142_v61 }
 0x2a9   :  { %v1023_v24 = vmul.f32 %v3145_v22, %v3145_v22  ;;  %v2336_v63 = vpop.f32.mrb[26].mxu0 }
 0x2aa   :  { %v3152_v1 = vsub.f32 %v3013_v30, %v2336_v63  ;;  %v874_v2 = vpop.f32.mrb[27].mxu0 }
 0x2ab   :  { %v3155_v26 = vsub.f32 %v3016_v31, %v874_v2  ;;  %2411 = vmatprep.mubr.f32.mxu1 %v1023_v24 }
 0x2ac   :  { %2412 = vmatmul.mubr.f32.gmra.mrb[56].mxu1 %v1024_v0  ;;  %v1026_v4 = vmul.f32 %v3152_v1, %v3152_v1 }
 0x2ad   :  { %v1025_v27 = vmul.f32 %v3155_v26, %v3155_v26  ;;  %v2339_v3 = vpop.f32.mrb[28].mxu0 }
 0x2ae   :  { %v3162_v5 = vsub.f32 %v3025_v34, %v2339_v3  ;;  %v884_v6 = vpop.f32.mrb[29].mxu0 }
 0x2af   :  { %v3165_v30 = vsub.f32 %v3028_v35, %v884_v6  ;;  %2414 = vmatprep.mubr.f32.mxu1 %v1025_v27 }
 0x2b0   :  { %2415 = vmatmul.mubr.f32.gmra.mrb[58].mxu1 %v1026_v4  ;;  %v1028_v8 = vmul.f32 %v3162_v5, %v3162_v5 }
 0x2b1   :  { %v1027_v31 = vmul.f32 %v3165_v30, %v3165_v30  ;;  %v2342_v7 = vpop.f32.mrb[30].mxu0 }
 0x2b2   :  { %v3172_v9 = vsub.f32 %v3037_v38, %v2342_v7  ;;  %v894_v42 = vpop.f32.mrb[31].mxu0 }
 0x2b3   :  { %v3175_v34 = vsub.f32 %v3040_v39, %v894_v42  ;;  %2417 = vmatprep.mubr.f32.mxu1 %v1027_v31 }
 0x2b4   :  { %2418 = vmatmul.mubr.f32.gmra.mrb[60].mxu1 %v1028_v8  ;;  %v1030_v46 = vmul.f32 %v3172_v9, %v3172_v9 }
 0x2b5   :  { %v1029_v35 = vmul.f32 %v3175_v34, %v3175_v34  ;;  %v2345_v44 = vpop.f32.mrb[32].mxu0 }
 0x2b6   :  { %v3182_v47 = vsub.f32 %v2959_v12, %v2345_v44  ;;  %v904_v48 = vpop.f32.mrb[33].mxu0 }
 0x2b7   :  { %v3185_v38 = vsub.f32 %v2962_v13, %v904_v48  ;;  %2420 = vmatprep.mubr.f32.mxu1 %v1029_v35 }
 0x2b8   :  { %2421 = vmatmul.mubr.f32.gmra.mrb[62].mxu1 %v1030_v46  ;;  %v1032_v10 = vmul.f32 %v3182_v47, %v3182_v47 }
 0x2b9   :  { %v1031_v39 = vmul.f32 %v3185_v38, %v3185_v38  ;;  %v2348_v50 = vpop.f32.mrb[34].mxu0 }
 0x2ba   :  { %v3192_v11 = vsub.f32 %v2970_v17, %v2348_v50  ;;  %v914_v52 = vpop.f32.mrb[35].mxu0 }
 0x2bb   :  { %v3195_v12 = vsub.f32 %v2974_v18, %v914_v52  ;;  %2423 = vmatprep.mubr.f32.mxu1 %v1031_v39 }
 0x2bc   :  { %2424 = vmatmul.mubr.f32.gmra.mrb[64].mxu1 %v1032_v10  ;;  %v1034_v15 = vmul.f32 %v3192_v11, %v3192_v11 }
 0x2bd   :  { %v1033_v13 = vmul.f32 %v3195_v12, %v3195_v12  ;;  %v2351_v54 = vpop.f32.mrb[36].mxu0 }
 0x2be   :  { %v3202_v55 = vsub.f32 %v2982_v21, %v2351_v54  ;;  %v924_v56 = vpop.f32.mrb[37].mxu0 }
 0x2bf   :  { %v3205_v17 = vsub.f32 %v2986_v16, %v924_v56  ;;  %2426 = vmatprep.mubr.f32.mxu1 %v1033_v13 }
 0x2c0   :  { %2427 = vmatmul.mubr.f32.gmra.mrb[66].mxu1 %v1034_v15  ;;  %v1036_v20 = vmul.f32 %v3202_v55, %v3202_v55 }
 0x2c1   :  { %v1035_v18 = vmul.f32 %v3205_v17, %v3205_v17  ;;  %v2354_v58 = vpop.f32.mrb[38].mxu0 }
 0x2c2   :  { %v3212_v59 = vsub.f32 %v2994_v25, %v2354_v58  ;;  %v934_v60 = vpop.f32.mrb[39].mxu0 }
 0x2c3   :  { %v3215_v21 = vsub.f32 %v2998_v23, %v934_v60  ;;  %2429 = vmatprep.mubr.f32.mxu1 %v1035_v18 }
 0x2c4   :  { %2430 = vmatmul.mubr.f32.gmra.mrb[68].mxu1 %v1036_v20  ;;  %v1038_v24 = vmul.f32 %v3212_v59, %v3212_v59 }
 0x2c5   :  { %v1037_v16 = vmul.f32 %v3215_v21, %v3215_v21  ;;  %v2357_v62 = vpop.f32.mrb[40].mxu0 }
 0x2c6   :  { %v3222_v63 = vsub.f32 %v3006_v28, %v2357_v62  ;;  %v944_v0 = vpop.f32.mrb[41].mxu0 }
 0x2c7   :  { %v3225_v25 = vsub.f32 %v3010_v29, %v944_v0  ;;  %2432 = vmatprep.mubr.f32.mxu1 %v1037_v16 }
 0x2c8   :  { %2433 = vmatmul.mubr.f32.gmra.mrb[70].mxu1 %v1038_v24  ;;  %v1040_v27 = vmul.f32 %v3222_v63, %v3222_v63 }
 0x2c9   :  { %v1039_v23 = vmul.f32 %v3225_v25, %v3225_v25  ;;  %v2360_v2 = vpop.f32.mrb[42].mxu0 }
 0x2ca   :  { %v3232_v3 = vsub.f32 %v3018_v32, %v2360_v2  ;;  %v954_v4 = vpop.f32.mrb[43].mxu0 }
 0x2cb   :  { %v3235_v28 = vsub.f32 %v3022_v33, %v954_v4  ;;  %2435 = vmatprep.mubr.f32.mxu1 %v1039_v23 }
 0x2cc   :  { %2436 = vmatmul.mubr.f32.gmra.mrb[72].mxu1 %v1040_v27  ;;  %v1042_v31 = vmul.f32 %v3232_v3, %v3232_v3 }
 0x2cd   :  { %v1041_v29 = vmul.f32 %v3235_v28, %v3235_v28  ;;  %v2363_v6 = vpop.f32.mrb[44].mxu0 }
 0x2ce   :  { %v3242_v7 = vsub.f32 %v3030_v36, %v2363_v6  ;;  %v964_v8 = vpop.f32.mrb[45].mxu0 }
 0x2cf   :  { %v3245_v32 = vsub.f32 %v3034_v37, %v964_v8  ;;  %2438 = vmatprep.mubr.f32.mxu1 %v1041_v29 }
 0x2d0   :  { %2439 = vmatmul.mubr.f32.gmra.mrb[74].mxu1 %v1042_v31  ;;  %v1044_v35 = vmul.f32 %v3242_v7, %v3242_v7 }
 0x2d1   :  { %v1043_v33 = vmul.f32 %v3245_v32, %v3245_v32  ;;  %v2366_v42 = vpop.f32.mrb[46].mxu0 }
 0x2d2   :  { %v3252_v44 = vsub.f32 %v3042_v40, %v2366_v42  ;;  %v974_v46 = vpop.f32.mrb[47].mxu0 }
 0x2d3   :  { %v3255_v36 = vsub.f32 %v3046_v41, %v974_v46  ;;  %2441 = vmatprep.mubr.f32.mxu1 %v1043_v33 }
 0x2d4   :  { %2442 = vmatmul.mubr.f32.gmra.mrb[76].mxu1 %v1044_v35  ;;  %v1046_v48 = vmul.f32 %v3252_v44, %v3252_v44 }
 0x2d5   :  { %v1045_v37 = vmul.f32 %v3255_v36, %v3255_v36 }
 0x2d7   :  { %2444 = vmatprep.mubr.f32.mxu1 %v1045_v37 }
 0x2d8   :  { %2445 = vmatmul.mubr.f32.gmra.mrb[78].mxu1 %v1046_v48 }
 0x36f   :  { %v2401_v39 = vpop.f32.mrb[48].mxu1 }
 0x370   :  { %v1273_v50 = vmul.f32 0.25, %v2401_v39  ;;  %v1113_v10 = vpop.f32.mrb[49].mxu1 }
 0x371   :  { %v1272_v52 = vmul.f32 0.25, %v1113_v10 }
 0x372   :  { %v1305_v40 = vadd.f32 1e-05, %v1273_v50 }
 0x373   :  { %v1304_v13 = vadd.f32 1e-05, %v1272_v52  ;;  %v2404_v54 = vpop.f32.mrb[50].mxu1 }
 0x374   :  { %v1275_v15 = vmul.f32 0.25, %v2404_v54  ;;  %v1123_v41 = vpop.f32.mrb[51].mxu1 }
 0x375   :  { %2607 = vrsqrt.f32 %v1304_v13  ;;  %v1274_v56 = vmul.f32 0.25, %v1123_v41 }
 0x376   :  { %2609 = vrsqrt.f32 %v1305_v40  ;;  %v1307_v18 = vadd.f32 1e-05, %v1275_v15 }
 0x377   :  { %v1306_v58 = vadd.f32 1e-05, %v1274_v56  ;;  %v2407_v20 = vpop.f32.mrb[52].mxu1 }
 0x378   :  { %v1277_v60 = vmul.f32 0.25, %v2407_v20  ;;  %v1133_v16 = vpop.f32.mrb[53].mxu1 }
 0x379   :  { %2611 = vrsqrt.f32 %v1306_v58  ;;  %v1276_v62 = vmul.f32 0.25, %v1133_v16 }
 0x37a   :  { %2613 = vrsqrt.f32 %v1307_v18  ;;  %v1309_v24 = vadd.f32 1e-05, %v1277_v60 }
 0x37b   :  { %v1308_v0 = vadd.f32 1e-05, %v1276_v62  ;;  %v2410_v23 = vpop.f32.mrb[54].mxu1 }
 0x37c   :  { %v1279_v2 = vmul.f32 0.25, %v2410_v23  ;;  %v1143_v27 = vpop.f32.mrb[55].mxu1 }
 0x37d   :  { %2615 = vrsqrt.f32 %v1308_v0  ;;  %v1278_v4 = vmul.f32 0.25, %v1143_v27 }
 0x37e   :  { %2617 = vrsqrt.f32 %v1309_v24  ;;  %v1311_v29 = vadd.f32 1e-05, %v1279_v2 }
 0x37f   :  { %v2608_v6 = vpop.eup %2607  ;;  %v1310_v31 = vadd.f32 1e-05, %v1278_v4  ;;  %v2413_v8 = vpop.f32.mrb[56].mxu1 }
 0x380   :  { %v2610_v33 = vpop.eup %2609  ;;  %v1281_v42 = vmul.f32 0.25, %v2413_v8  ;;  %v1153_v35 = vpop.f32.mrb[57].mxu1  ;;  %2455 = vmatprep.mubr.msk.f32.mxu0 %vm661_vm1, %v2608_v6 }
 0x381   :  { %2619 = vrsqrt.f32 %v1310_v31  ;;  %v1280_v46 = vmul.f32 0.25, %v1153_v35  ;;  %2456 = vmatmul.mubr.msk.f32.vlgmr.msra.gmra.mrb[48].mxu0 %vm661_vm1, %v2610_v33 }
 0x382   :  { %2621 = vrsqrt.f32 %v1311_v29  ;;  %v1313_v37 = vadd.f32 1e-05, %v1281_v42 }
 0x383   :  { %v2612_v48 = vpop.eup %2611  ;;  %v1312_v39 = vadd.f32 1e-05, %v1280_v46  ;;  %v2416_v50 = vpop.f32.mrb[58].mxu1 }
 0x384   :  { %v2614_v10 = vpop.eup %2613  ;;  %v1283_v52 = vmul.f32 0.25, %v2416_v50  ;;  %v1163_v40 = vpop.f32.mrb[59].mxu1  ;;  %2458 = vmatprep.mubr.msk.f32.mxu0 %vm661_vm1, %v2612_v48 }
 0x385   :  { %2623 = vrsqrt.f32 %v1312_v39  ;;  %v1282_v13 = vmul.f32 0.25, %v1163_v40  ;;  %2459 = vmatmul.mubr.msk.f32.gmra.mrb[50].mxu0 %vm661_vm1, %v2614_v10 }
 0x386   :  { %2625 = vrsqrt.f32 %v1313_v37  ;;  %v1315_v54 = vadd.f32 1e-05, %v1283_v52 }
 0x387   :  { %v2616_v15 = vpop.eup %2615  ;;  %v1314_v41 = vadd.f32 1e-05, %v1282_v13  ;;  %v2419_v56 = vpop.f32.mrb[60].mxu1 }
 0x388   :  { %v2618_v18 = vpop.eup %2617  ;;  %v1285_v58 = vmul.f32 0.25, %v2419_v56  ;;  %v1173_v20 = vpop.f32.mrb[61].mxu1  ;;  %2461 = vmatprep.mubr.msk.f32.mxu0 %vm661_vm1, %v2616_v15 }
 0x389   :  { %2627 = vrsqrt.f32 %v1314_v41  ;;  %v1284_v60 = vmul.f32 0.25, %v1173_v20  ;;  %2462 = vmatmul.mubr.msk.f32.gmra.mrb[52].mxu0 %vm661_vm1, %v2618_v18 }
 0x38a   :  { %2629 = vrsqrt.f32 %v1315_v54  ;;  %v1317_v16 = vadd.f32 1e-05, %v1285_v58 }
 0x38b   :  { %v2620_v62 = vpop.eup %2619  ;;  %v1316_v24 = vadd.f32 1e-05, %v1284_v60  ;;  %v2422_v0 = vpop.f32.mrb[62].mxu1 }
 0x38c   :  { %v2622_v23 = vpop.eup %2621  ;;  %v1287_v2 = vmul.f32 0.25, %v2422_v0  ;;  %v1183_v27 = vpop.f32.mrb[63].mxu1  ;;  %2464 = vmatprep.mubr.msk.f32.mxu0 %vm661_vm1, %v2620_v62 }
 0x38d   :  { %2631 = vrsqrt.f32 %v1316_v24  ;;  %v1286_v4 = vmul.f32 0.25, %v1183_v27  ;;  %2465 = vmatmul.mubr.msk.f32.gmra.mrb[54].mxu0 %vm661_vm1, %v2622_v23 }
 0x38e   :  { %2633 = vrsqrt.f32 %v1317_v16  ;;  %v1319_v29 = vadd.f32 1e-05, %v1287_v2 }
 0x38f   :  { %v2624_v6 = vpop.eup %2623  ;;  %v1318_v31 = vadd.f32 1e-05, %v1286_v4  ;;  %v2425_v8 = vpop.f32.mrb[64].mxu1 }
 0x390   :  { %v2626_v33 = vpop.eup %2625  ;;  %v1289_v42 = vmul.f32 0.25, %v2425_v8  ;;  %v1193_v35 = vpop.f32.mrb[65].mxu1  ;;  %2467 = vmatprep.mubr.msk.f32.mxu0 %vm661_vm1, %v2624_v6 }
 0x391   :  { %2635 = vrsqrt.f32 %v1318_v31  ;;  %v1288_v46 = vmul.f32 0.25, %v1193_v35  ;;  %2468 = vmatmul.mubr.msk.f32.gmra.mrb[56].mxu0 %vm661_vm1, %v2626_v33 }
 0x392   :  { %2637 = vrsqrt.f32 %v1319_v29  ;;  %v1321_v37 = vadd.f32 1e-05, %v1289_v42 }
 0x393   :  { %v2628_v48 = vpop.eup %2627  ;;  %v1320_v39 = vadd.f32 1e-05, %v1288_v46  ;;  %v2428_v50 = vpop.f32.mrb[66].mxu1 }
 0x394   :  { %v2630_v10 = vpop.eup %2629  ;;  %v1291_v52 = vmul.f32 0.25, %v2428_v50  ;;  %v1203_v40 = vpop.f32.mrb[67].mxu1  ;;  %2470 = vmatprep.mubr.msk.f32.mxu0 %vm661_vm1, %v2628_v48 }
 0x395   :  { %2639 = vrsqrt.f32 %v1320_v39  ;;  %v1290_v13 = vmul.f32 0.25, %v1203_v40  ;;  %2471 = vmatmul.mubr.msk.f32.gmra.mrb[58].mxu0 %vm661_vm1, %v2630_v10 }
 0x396   :  { %2641 = vrsqrt.f32 %v1321_v37  ;;  %v1323_v54 = vadd.f32 1e-05, %v1291_v52 }
 0x397   :  { %v2632_v15 = vpop.eup %2631  ;;  %v1322_v41 = vadd.f32 1e-05, %v1290_v13  ;;  %v2431_v56 = vpop.f32.mrb[68].mxu1 }
 0x398   :  { %v2634_v18 = vpop.eup %2633  ;;  %v1293_v58 = vmul.f32 0.25, %v2431_v56  ;;  %v1213_v20 = vpop.f32.mrb[69].mxu1  ;;  %2473 = vmatprep.mubr.msk.f32.mxu0 %vm661_vm1, %v2632_v15 }
 0x399   :  { %2643 = vrsqrt.f32 %v1322_v41  ;;  %v1292_v60 = vmul.f32 0.25, %v1213_v20  ;;  %2474 = vmatmul.mubr.msk.f32.gmra.mrb[60].mxu0 %vm661_vm1, %v2634_v18 }
 0x39a   :  { %2645 = vrsqrt.f32 %v1323_v54  ;;  %v1325_v16 = vadd.f32 1e-05, %v1293_v58 }
 0x39b   :  { %v2636_v62 = vpop.eup %2635  ;;  %v1324_v24 = vadd.f32 1e-05, %v1292_v60  ;;  %v2434_v0 = vpop.f32.mrb[70].mxu1 }
 0x39c   :  { %v2638_v23 = vpop.eup %2637  ;;  %v1295_v2 = vmul.f32 0.25, %v2434_v0  ;;  %v1223_v27 = vpop.f32.mrb[71].mxu1  ;;  %2476 = vmatprep.mubr.msk.f32.mxu0 %vm661_vm1, %v2636_v62 }
 0x39d   :  { %2647 = vrsqrt.f32 %v1324_v24  ;;  %v1294_v4 = vmul.f32 0.25, %v1223_v27  ;;  %2477 = vmatmul.mubr.msk.f32.gmra.mrb[62].mxu0 %vm661_vm1, %v2638_v23 }
 0x39e   :  { %2649 = vrsqrt.f32 %v1325_v16  ;;  %v1327_v29 = vadd.f32 1e-05, %v1295_v2 }
 0x39f   :  { %v2640_v6 = vpop.eup %2639  ;;  %v1326_v31 = vadd.f32 1e-05, %v1294_v4  ;;  %v2437_v8 = vpop.f32.mrb[72].mxu1 }
 0x3a0   :  { %v2642_v33 = vpop.eup %2641  ;;  %v1297_v42 = vmul.f32 0.25, %v2437_v8  ;;  %v1233_v35 = vpop.f32.mrb[73].mxu1  ;;  %2479 = vmatprep.mubr.msk.f32.mxu0 %vm661_vm1, %v2640_v6 }
 0x3a1   :  { %2651 = vrsqrt.f32 %v1326_v31  ;;  %v1296_v46 = vmul.f32 0.25, %v1233_v35  ;;  %2480 = vmatmul.mubr.msk.f32.gmra.mrb[64].mxu0 %vm661_vm1, %v2642_v33 }
 0x3a2   :  { %2653 = vrsqrt.f32 %v1327_v29  ;;  %v1329_v37 = vadd.f32 1e-05, %v1297_v42 }
 0x3a3   :  { %v2644_v48 = vpop.eup %2643  ;;  %v1328_v39 = vadd.f32 1e-05, %v1296_v46  ;;  %v2440_v50 = vpop.f32.mrb[74].mxu1 }
 0x3a4   :  { %v2646_v10 = vpop.eup %2645  ;;  %v1299_v52 = vmul.f32 0.25, %v2440_v50  ;;  %v1243_v40 = vpop.f32.mrb[75].mxu1  ;;  %2482 = vmatprep.mubr.msk.f32.mxu0 %vm661_vm1, %v2644_v48 }
 0x3a5   :  { %2655 = vrsqrt.f32 %v1328_v39  ;;  %v1298_v13 = vmul.f32 0.25, %v1243_v40  ;;  %2483 = vmatmul.mubr.msk.f32.gmra.mrb[66].mxu0 %vm661_vm1, %v2646_v10  ;;  %v3296_v39 = vld [vmem:[%s3499_s2] ss:$0 sm:$0xff]  ;;  %v3302_v40 = vld [vmem:[%s3499_s2 + $0x1] ss:$0 sm:$0xff] }
 0x3a6   :  { %2657 = vrsqrt.f32 %v1329_v37  ;;  %v1331_v54 = vadd.f32 1e-05, %v1299_v52 }
 0x3a7   :  { %v2648_v15 = vpop.eup %2647  ;;  %v1330_v41 = vadd.f32 1e-05, %v1298_v13  ;;  %v2443_v56 = vpop.f32.mrb[76].mxu1 }
 0x3a8   :  { %v2650_v18 = vpop.eup %2649  ;;  %v1301_v58 = vmul.f32 0.25, %v2443_v56  ;;  %v1253_v20 = vpop.f32.mrb[77].mxu1  ;;  %2485 = vmatprep.mubr.msk.f32.mxu0 %vm661_vm1, %v2648_v15 }
 0x3a9   :  { %2659 = vrsqrt.f32 %v1330_v41  ;;  %v1300_v60 = vmul.f32 0.25, %v1253_v20  ;;  %2486 = vmatmul.mubr.msk.f32.gmra.mrb[68].mxu0 %vm661_vm1, %v2650_v18 }
 0x3aa   :  { %2661 = vrsqrt.f32 %v1331_v54  ;;  %v1333_v16 = vadd.f32 1e-05, %v1301_v58 }
 0x3ab   :  { %v2652_v62 = vpop.eup %2651  ;;  %v1332_v24 = vadd.f32 1e-05, %v1300_v60  ;;  %v2446_v0 = vpop.f32.mrb[78].mxu1 }
 0x3ac   :  { %v2654_v23 = vpop.eup %2653  ;;  %v1303_v2 = vmul.f32 0.25, %v2446_v0  ;;  %v1263_v27 = vpop.f32.mrb[79].mxu1  ;;  %2488 = vmatprep.mubr.msk.f32.mxu0 %vm661_vm1, %v2652_v62 }
 0x3ad   :  { %2663 = vrsqrt.f32 %v1332_v24  ;;  %v1302_v4 = vmul.f32 0.25, %v1263_v27  ;;  %2489 = vmatmul.mubr.msk.f32.gmra.mrb[70].mxu0 %vm661_vm1, %v2654_v23 }
 0x3ae   :  { %2665 = vrsqrt.f32 %v1333_v16  ;;  %v1335_v29 = vadd.f32 1e-05, %v1303_v2 }
 0x3af   :  { %v2656_v6 = vpop.eup %2655  ;;  %v1334_v31 = vadd.f32 1e-05, %v1302_v4 }
 0x3b0   :  { %v2658_v8 = vpop.eup %2657  ;;  %2491 = vmatprep.mubr.msk.f32.mxu0 %vm661_vm1, %v2656_v6 }
 0x3b1   :  { %2667 = vrsqrt.f32 %v1334_v31  ;;  %2492 = vmatmul.mubr.msk.f32.gmra.mrb[72].mxu0 %vm661_vm1, %v2658_v8 }
 0x3b2   :  { %2669 = vrsqrt.f32 %v1335_v29 }
 0x3b3   :  { %v2660_v33 = vpop.eup %2659 }
 0x3b4   :  { %v2662_v42 = vpop.eup %2661  ;;  %2494 = vmatprep.mubr.msk.f32.mxu0 %vm661_vm1, %v2660_v33 }
 0x3b5   :  { %2495 = vmatmul.mubr.msk.f32.gmra.mrb[74].mxu0 %vm661_vm1, %v2662_v42 }
 0x3b7   :  { %v2664_v35 = vpop.eup %2663 }
 0x3b8   :  { %v2666_v46 = vpop.eup %2665  ;;  %2497 = vmatprep.mubr.msk.f32.mxu0 %vm661_vm1, %v2664_v35 }
 0x3b9   :  { %2498 = vmatmul.mubr.msk.f32.gmra.mrb[76].mxu0 %vm661_vm1, %v2666_v46 }
 0x3bb   :  { %v2668_v37 = vpop.eup %2667 }
 0x3bc   :  { %v2670_v48 = vpop.eup %2669  ;;  %2500 = vmatprep.mubr.msk.f32.mxu0 %vm661_vm1, %v2668_v37 }
 0x3bd   :  { %2501 = vmatmul.mubr.msk.f32.gmra.mrb[78].mxu0 %vm661_vm1, %v2670_v48 }
 0x454   :  { %v2457_v50 = vpop.f32.mrb[48].mxu0 }
 0x455   :  { %v1690_v10 = vmul.f32 %v2457_v50, %v3102_v43  ;;  %v1530_v52 = vpop.f32.mrb[49].mxu0 }
 0x456   :  { %v1689_v13 = vmul.f32 %v1530_v52, %v3105_v45 }
 0x457   :  { %v1726_v54 = vmul.f32 %v3296_v39, %v1690_v10 }
 0x458   :  { %v1725_v15 = vmul.f32 %v3296_v39, %v1689_v13  ;;  %v2460_v41 = vpop.f32.mrb[50].mxu0 }
 0x459   :  { %v1762_v56 = vadd.f32 %v3302_v40, %v1726_v54  ;;  %v1692_v18 = vmul.f32 %v2460_v41, %v3112_v49  ;;  %v1540_v58 = vpop.f32.mrb[51].mxu0 }
 0x45a   :  { %v1761_v43 = vadd.f32 %v3302_v40, %v1725_v15  ;;  %v1691_v20 = vmul.f32 %v1540_v58, %v3115_v51 }
 0x45b   :  { %v1794_v60 = vmax.f32 %v1762_v56, 0.0  ;;  %v1728_v16 = vmul.f32 %v3296_v39, %v1692_v18 }
 0x45c   :  { %v1793_v62 = vmax.f32 %v1761_v43, 0.0  ;;  %v1727_v45 = vmul.f32 %v3296_v39, %v1691_v20  ;;  %v2463_v24 = vpop.f32.mrb[52].mxu0 }
 0x45d   :  { %1826 = vst [vmem:[%s3500_s5 + $0x8] sm:$0xff] %v1794_v60  ;;  %v1764_v0 = vadd.f32 %v3302_v40, %v1728_v16  ;;  %v1694_v49 = vmul.f32 %v2463_v24, %v3122_v53  ;;  %v1550_v23 = vpop.f32.mrb[53].mxu0 }
 0x45e   :  { %1825 = vst [vmem:[%s3500_s5] sm:$0xff] %v1793_v62  ;;  %v1763_v51 = vadd.f32 %v3302_v40, %v1727_v45  ;;  %v1693_v2 = vmul.f32 %v1550_v23, %v3125_v14 }
 0x45f   :  { %v1796_v27 = vmax.f32 %v1764_v0, 0.0  ;;  %v1730_v4 = vmul.f32 %v3296_v39, %v1694_v49 }
 0x460   :  { %v1795_v29 = vmax.f32 %v1763_v51, 0.0  ;;  %v1729_v6 = vmul.f32 %v3296_v39, %v1693_v2  ;;  %v2466_v31 = vpop.f32.mrb[54].mxu0 }
 0x461   :  { %1828 = vst [vmem:[%s3500_s5 + $0x18] sm:$0xff] %v1796_v27  ;;  %v1766_v53 = vadd.f32 %v3302_v40, %v1730_v4  ;;  %v1696_v8 = vmul.f32 %v2466_v31, %v3132_v57  ;;  %v1560_v33 = vpop.f32.mrb[55].mxu0 }
 0x462   :  { %1827 = vst [vmem:[%s3500_s5 + $0x10] sm:$0xff] %v1795_v29  ;;  %v1765_v14 = vadd.f32 %v3302_v40, %v1729_v6  ;;  %v1695_v42 = vmul.f32 %v1560_v33, %v3135_v19 }
 0x463   :  { %v1798_v35 = vmax.f32 %v1766_v53, 0.0  ;;  %v1732_v46 = vmul.f32 %v3296_v39, %v1696_v8 }
 0x464   :  { %v1797_v37 = vmax.f32 %v1765_v14, 0.0  ;;  %v1731_v48 = vmul.f32 %v3296_v39, %v1695_v42  ;;  %v2469_v50 = vpop.f32.mrb[56].mxu0 }
 0x465   :  { %1830 = vst [vmem:[%s3500_s5 + $0x28] sm:$0xff] %v1798_v35  ;;  %v1768_v57 = vadd.f32 %v3302_v40, %v1732_v46  ;;  %v1698_v10 = vmul.f32 %v2469_v50, %v3142_v61  ;;  %v1570_v52 = vpop.f32.mrb[57].mxu0 }
 0x466   :  { %1829 = vst [vmem:[%s3500_s5 + $0x20] sm:$0xff] %v1797_v37  ;;  %v1767_v19 = vadd.f32 %v3302_v40, %v1731_v48  ;;  %v1697_v13 = vmul.f32 %v1570_v52, %v3145_v22 }
 0x467   :  { %v1800_v54 = vmax.f32 %v1768_v57, 0.0  ;;  %v1734_v15 = vmul.f32 %v3296_v39, %v1698_v10 }
 0x468   :  { %v1799_v41 = vmax.f32 %v1767_v19, 0.0  ;;  %v1733_v56 = vmul.f32 %v3296_v39, %v1697_v13  ;;  %v2472_v18 = vpop.f32.mrb[58].mxu0 }
 0x469   :  { %1832 = vst [vmem:[%s3500_s5 + $0x38] sm:$0xff] %v1800_v54  ;;  %v1770_v61 = vadd.f32 %v3302_v40, %v1734_v15  ;;  %v1700_v58 = vmul.f32 %v2472_v18, %v3152_v1  ;;  %v1580_v43 = vpop.f32.mrb[59].mxu0 }
 0x46a   :  { %1831 = vst [vmem:[%s3500_s5 + $0x30] sm:$0xff] %v1799_v41  ;;  %v1769_v22 = vadd.f32 %v3302_v40, %v1733_v56  ;;  %v1699_v20 = vmul.f32 %v1580_v43, %v3155_v26 }
 0x46b   :  { %v1802_v60 = vmax.f32 %v1770_v61, 0.0  ;;  %v1736_v16 = vmul.f32 %v3296_v39, %v1700_v58 }
 0x46c   :  { %v1801_v62 = vmax.f32 %v1769_v22, 0.0  ;;  %v1735_v45 = vmul.f32 %v3296_v39, %v1699_v20  ;;  %v2475_v24 = vpop.f32.mrb[60].mxu0 }
 0x46d   :  { %1834 = vst [vmem:[%s3500_s5 + $0x48] sm:$0xff] %v1802_v60  ;;  %v1772_v1 = vadd.f32 %v3302_v40, %v1736_v16  ;;  %v1702_v0 = vmul.f32 %v2475_v24, %v3162_v5  ;;  %v1590_v49 = vpop.f32.mrb[61].mxu0 }
 0x46e   :  { %1833 = vst [vmem:[%s3500_s5 + $0x40] sm:$0xff] %v1801_v62  ;;  %v1771_v26 = vadd.f32 %v3302_v40, %v1735_v45  ;;  %v1701_v23 = vmul.f32 %v1590_v49, %v3165_v30 }
 0x46f   :  { %v1804_v51 = vmax.f32 %v1772_v1, 0.0  ;;  %v1738_v2 = vmul.f32 %v3296_v39, %v1702_v0 }
 0x470   :  { %v1803_v27 = vmax.f32 %v1771_v26, 0.0  ;;  %v1737_v4 = vmul.f32 %v3296_v39, %v1701_v23  ;;  %v2478_v29 = vpop.f32.mrb[62].mxu0 }
 0x471   :  { %1836 = vst [vmem:[%s3500_s5 + $0x58] sm:$0xff] %v1804_v51  ;;  %v1774_v5 = vadd.f32 %v3302_v40, %v1738_v2  ;;  %v1704_v6 = vmul.f32 %v2478_v29, %v3172_v9  ;;  %v1600_v31 = vpop.f32.mrb[63].mxu0 }
 0x472   :  { %1835 = vst [vmem:[%s3500_s5 + $0x50] sm:$0xff] %v1803_v27  ;;  %v1773_v30 = vadd.f32 %v3302_v40, %v1737_v4  ;;  %v1703_v53 = vmul.f32 %v1600_v31, %v3175_v34 }
 0x473   :  { %v1806_v8 = vmax.f32 %v1774_v5, 0.0  ;;  %v1740_v33 = vmul.f32 %v3296_v39, %v1704_v6 }
 0x474   :  { %v1805_v14 = vmax.f32 %v1773_v30, 0.0  ;;  %v1739_v42 = vmul.f32 %v3296_v39, %v1703_v53  ;;  %v2481_v35 = vpop.f32.mrb[64].mxu0 }
 0x475   :  { %1838 = vst [vmem:[%s3500_s5 + $0x68] sm:$0xff] %v1806_v8  ;;  %v1776_v9 = vadd.f32 %v3302_v40, %v1740_v33  ;;  %v1706_v46 = vmul.f32 %v2481_v35, %v3182_v47  ;;  %v1610_v37 = vpop.f32.mrb[65].mxu0 }
 0x476   :  { %1837 = vst [vmem:[%s3500_s5 + $0x60] sm:$0xff] %v1805_v14  ;;  %v1775_v34 = vadd.f32 %v3302_v40, %v1739_v42  ;;  %v1705_v48 = vmul.f32 %v1610_v37, %v3185_v38 }
 0x477   :  { %v1808_v50 = vmax.f32 %v1776_v9, 0.0  ;;  %v1742_v57 = vmul.f32 %v3296_v39, %v1706_v46 }
 0x478   :  { %v1807_v10 = vmax.f32 %v1775_v34, 0.0  ;;  %v1741_v52 = vmul.f32 %v3296_v39, %v1705_v48  ;;  %v2484_v19 = vpop.f32.mrb[66].mxu0 }
 0x479   :  { %1840 = vst [vmem:[%s3500_s5 + $0x78] sm:$0xff] %v1808_v50  ;;  %v1778_v47 = vadd.f32 %v3302_v40, %v1742_v57  ;;  %v1708_v13 = vmul.f32 %v2484_v19, %v3192_v11  ;;  %v1620_v54 = vpop.f32.mrb[67].mxu0 }
 0x47a   :  { %1839 = vst [vmem:[%s3500_s5 + $0x70] sm:$0xff] %v1807_v10  ;;  %v1777_v38 = vadd.f32 %v3302_v40, %v1741_v52  ;;  %v1707_v15 = vmul.f32 %v1620_v54, %v3195_v12 }
 0x47b   :  { %v1810_v41 = vmax.f32 %v1778_v47, 0.0  ;;  %v1744_v56 = vmul.f32 %v3296_v39, %v1708_v13 }
 0x47c   :  { %v1809_v18 = vmax.f32 %v1777_v38, 0.0  ;;  %v1743_v61 = vmul.f32 %v3296_v39, %v1707_v15  ;;  %v2487_v58 = vpop.f32.mrb[68].mxu0 }
 0x47d   :  { %1842 = vst [vmem:[%s3500_s5 + $0x88] sm:$0xff] %v1810_v41  ;;  %v1780_v11 = vadd.f32 %v3302_v40, %v1744_v56  ;;  %v1710_v43 = vmul.f32 %v2487_v58, %v3202_v55  ;;  %v1630_v22 = vpop.f32.mrb[69].mxu0 }
 0x47e   :  { %1841 = vst [vmem:[%s3500_s5 + $0x80] sm:$0xff] %v1809_v18  ;;  %v1779_v12 = vadd.f32 %v3302_v40, %v1743_v61  ;;  %v1709_v20 = vmul.f32 %v1630_v22, %v3205_v17 }
 0x47f   :  { %v1812_v60 = vmax.f32 %v1780_v11, 0.0  ;;  %v1746_v16 = vmul.f32 %v3296_v39, %v1710_v43 }
 0x480   :  { %v1811_v62 = vmax.f32 %v1779_v12, 0.0  ;;  %v1745_v45 = vmul.f32 %v3296_v39, %v1709_v20  ;;  %v2490_v24 = vpop.f32.mrb[70].mxu0 }
 0x481   :  { %1844 = vst [vmem:[%s3500_s5 + $0x98] sm:$0xff] %v1812_v60  ;;  %v1782_v55 = vadd.f32 %v3302_v40, %v1746_v16  ;;  %v1712_v1 = vmul.f32 %v2490_v24, %v3212_v59  ;;  %v1640_v0 = vpop.f32.mrb[71].mxu0 }
 0x482   :  { %1843 = vst [vmem:[%s3500_s5 + $0x90] sm:$0xff] %v1811_v62  ;;  %v1781_v17 = vadd.f32 %v3302_v40, %v1745_v45  ;;  %v1711_v49 = vmul.f32 %v1640_v0, %v3215_v21 }
 0x483   :  { %v1814_v26 = vmax.f32 %v1782_v55, 0.0  ;;  %v1748_v23 = vmul.f32 %v3296_v39, %v1712_v1 }
 0x484   :  { %v1813_v51 = vmax.f32 %v1781_v17, 0.0  ;;  %v1747_v2 = vmul.f32 %v3296_v39, %v1711_v49  ;;  %v2493_v27 = vpop.f32.mrb[72].mxu0 }
 0x485   :  { %1846 = vst [vmem:[%s3500_s5 + $0xa8] sm:$0xff] %v1814_v26  ;;  %v1784_v59 = vadd.f32 %v3302_v40, %v1748_v23  ;;  %v1714_v4 = vmul.f32 %v2493_v27, %v3222_v63  ;;  %v1650_v29 = vpop.f32.mrb[73].mxu0 }
 0x486   :  { %1845 = vst [vmem:[%s3500_s5 + $0xa0] sm:$0xff] %v1813_v51  ;;  %v1783_v21 = vadd.f32 %v3302_v40, %v1747_v2  ;;  %v1713_v5 = vmul.f32 %v1650_v29, %v3225_v25 }
 0x487   :  { %v1816_v6 = vmax.f32 %v1784_v59, 0.0  ;;  %v1750_v31 = vmul.f32 %v3296_v39, %v1714_v4 }
 0x488   :  { %v1815_v30 = vmax.f32 %v1783_v21, 0.0  ;;  %v1749_v53 = vmul.f32 %v3296_v39, %v1713_v5  ;;  %v2496_v8 = vpop.f32.mrb[74].mxu0 }
 0x489   :  { %1848 = vst [vmem:[%s3500_s5 + $0xb8] sm:$0xff] %v1816_v6  ;;  %v1786_v63 = vadd.f32 %v3302_v40, %v1750_v31  ;;  %v1716_v33 = vmul.f32 %v2496_v8, %v3232_v3  ;;  %v1660_v14 = vpop.f32.mrb[75].mxu0 }
 0x48a   :  { %1847 = vst [vmem:[%s3500_s5 + $0xb0] sm:$0xff] %v1815_v30  ;;  %v1785_v25 = vadd.f32 %v3302_v40, %v1749_v53  ;;  %v1715_v42 = vmul.f32 %v1660_v14, %v3235_v28 }
 0x48b   :  { %v1818_v35 = vmax.f32 %v1786_v63, 0.0  ;;  %v1752_v9 = vmul.f32 %v3296_v39, %v1716_v33 }
 0x48c   :  { %v1817_v46 = vmax.f32 %v1785_v25, 0.0  ;;  %v1751_v37 = vmul.f32 %v3296_v39, %v1715_v42  ;;  %v2499_v34 = vpop.f32.mrb[76].mxu0 }
 0x48d   :  { %1850 = vst [vmem:[%s3500_s5 + $0xc8] sm:$0xff] %v1818_v35  ;;  %v1788_v3 = vadd.f32 %v3302_v40, %v1752_v9  ;;  %v1718_v48 = vmul.f32 %v2499_v34, %v3242_v7  ;;  %v1670_v50 = vpop.f32.mrb[77].mxu0 }
 0x48e   :  { %1849 = vst [vmem:[%s3500_s5 + $0xc0] sm:$0xff] %v1817_v46  ;;  %v1787_v28 = vadd.f32 %v3302_v40, %v1751_v37  ;;  %v1717_v57 = vmul.f32 %v1670_v50, %v3245_v32 }
 0x48f   :  { %v1820_v10 = vmax.f32 %v1788_v3, 0.0  ;;  %v1754_v52 = vmul.f32 %v3296_v39, %v1718_v48 }
 0x490   :  { %v1819_v19 = vmax.f32 %v1787_v28, 0.0  ;;  %v1753_v47 = vmul.f32 %v3296_v39, %v1717_v57  ;;  %v2502_v13 = vpop.f32.mrb[78].mxu0 }
 0x491   :  { %1852 = vst [vmem:[%s3500_s5 + $0xd8] sm:$0xff] %v1820_v10  ;;  %v1790_v7 = vadd.f32 %v3302_v40, %v1754_v52  ;;  %v1720_v54 = vmul.f32 %v2502_v13, %v3252_v44  ;;  %v1680_v38 = vpop.f32.mrb[79].mxu0 }
 0x492   :  { %1851 = vst [vmem:[%s3500_s5 + $0xd0] sm:$0xff] %v1819_v19  ;;  %v1789_v32 = vadd.f32 %v3302_v40, %v1753_v47  ;;  %v1719_v15 = vmul.f32 %v1680_v38, %v3255_v36 }
 0x493   :  { %v1822_v41 = vmax.f32 %v1790_v7, 0.0  ;;  %v1756_v56 = vmul.f32 %v3296_v39, %v1720_v54 }
 0x494   :  { %v1821_v18 = vmax.f32 %v1789_v32, 0.0  ;;  %v1755_v61 = vmul.f32 %v3296_v39, %v1719_v15 }
 0x495   :  { %1854 = vst [vmem:[%s3500_s5 + $0xe8] sm:$0xff] %v1822_v41  ;;  %v1792_v44 = vadd.f32 %v3302_v40, %v1756_v56 }
 0x496   :  { %1853 = vst [vmem:[%s3500_s5 + $0xe0] sm:$0xff] %v1821_v18  ;;  %v1791_v58 = vadd.f32 %v3302_v40, %v1755_v61 }
 0x497   :  { %v1824_v11 = vmax.f32 %v1792_v44, 0.0 }
 0x498   :  { %v1823_v36 = vmax.f32 %v1791_v58, 0.0 }
 0x499   :  { %1856 = vst [vmem:[%s3500_s5 + $0xf8] sm:$0xff] %v1824_v11 }
 0x49a   :  { %1855 = vst [vmem:[%s3500_s5 + $0xf0] sm:$0xff] %v1823_v36 }

</bundles_post_ra>
